<compile_context>
chip_gen: v7x
topology: tpu7x:2x2x1
jax: 0.10.0
libtpu: 0.0.40
codegen_flags: <defaults>
</compile_context>

<pallas_src>
import functools

import jax
import jax.numpy as jnp
import numpy as np
from jax.experimental import pallas as pl
from jax.experimental.pallas import tpu as pltpu


def _round_up(x, m):
    return (x + m - 1) // m * m


def _device_kind():
    try:
        return jax.devices()[0].device_kind.lower()
    except Exception:
        return ""


def _fm_kernel(idx_ref, w_ref, sel_ref, bias_ref, out_ref, *,
               embed_dim, mp, chunk, num_chunks, two_byte):
    """One batch tile with the batch on the lane axis.

    idx_ref : (F, TB)       int32  global token ids (field offsets pre-added)
    w_ref   : (2*MP, VPAD)  bf16   [hi ; lo] of [emb.T ; sumsq ; lin.T ; pad]
    sel_ref : (VPAD, F)     bf16   one-hot "owner field" selector per vocab row
    bias_ref: (1,)          f32    (SMEM) FeaturesLinear bias
    out_ref : (1, TB)       f32    sigmoid(linear + fm)
    """
    e = embed_dim
    tb = idx_ref.shape[1]

    idx = idx_ref[...]                                   # (F, TB) int32
    idx_lo = (idx & 0xFF).astype(jnp.bfloat16)           # exact: values <= 255
    if two_byte:
        idx_hi = (idx >> 8).astype(jnp.bfloat16)         # exact while V < 2**16

    acc = jnp.zeros((mp, tb), jnp.float32)
    # Vocab (contraction) axis in MXU-width chunks: bounds vreg live ranges.
    for c in range(num_chunks):
        v0 = c * chunk
        sel_c = sel_ref[v0:v0 + chunk, :]                # (chunk, F) bf16

        # MXU "gather": owner[v, b] = idx[owner_field(v), b]   (exact integers)
        owner = jnp.dot(sel_c, idx_lo, preferred_element_type=jnp.float32)
        if two_byte:
            owner = owner + 256.0 * jnp.dot(
                sel_c, idx_hi, preferred_element_type=jnp.float32)

        iota = (jax.lax.broadcasted_iota(jnp.int32, (chunk, tb), 0) + v0
                ).astype(jnp.float32)
        # Single compare pass (instead of F): one-hot membership, exact in bf16.
        m = (iota == owner).astype(jnp.bfloat16)         # (chunk, TB)

        # One stacked matmul: the hi and lo table halves share the RHS pushes.
        res = jnp.dot(w_ref[:, v0:v0 + chunk], m,
                      preferred_element_type=jnp.float32)   # (2*MP, TB)
        acc = acc + res[:mp, :] + res[mp:, :]

    s = acc[0:e, :]                        # (E, TB)  sum_f emb[idx_f]
    sumsq = acc[e:e + 1, :]                # (1, TB)  sum_f sum_d emb[idx_f,d]^2
    lin = acc[e + 1:e + 2, :]              # (1, TB)  sum_f w_lin[idx_f]
    fm = 0.5 * (jnp.sum(s * s, axis=0, keepdims=True) - sumsq)
    out_ref[...] = jax.nn.sigmoid(fm + lin + bias_ref[0])   # lane-dense store


def init_params(key, field_dims, embed_dim):
    """Raw model parameters, matching the PyTorch module's init."""
    vocab = int(sum(field_dims))
    k_emb, k_lin = jax.random.split(key, 2)

    # FeaturesEmbedding: xavier uniform.
    bound = float(np.sqrt(6.0 / (vocab + embed_dim)))
    emb_table = jax.random.uniform(k_emb, (vocab, embed_dim), jnp.float32,
                                   -bound, bound)

    # FeaturesLinear: Embedding(vocab, 1) default init ~ N(0, 1); bias zeros.
    lin_table = jax.random.normal(k_lin, (vocab, 1), jnp.float32)
    lin_bias = jnp.zeros((1,), jnp.float32)

    offsets = jnp.asarray(
        np.array((0, *np.cumsum(field_dims)[:-1]), dtype=np.int32))
    return dict(emb_table=emb_table, lin_table=lin_table, lin_bias=lin_bias,
                offsets=offsets, field_dims=tuple(int(d) for d in field_dims))


def pack_params(params):
    """One-time packing of FM weights for the kernel (hoisted out of forward)."""
    emb = params["emb_table"]                # (V, E) f32
    lin = params["lin_table"]                # (V, 1) f32
    V, E = emb.shape
    field_dims = params["field_dims"]
    F = len(field_dims)
    if V >= (1 << 16):
        # TODO(synk): switch to the PrefetchScalarGridSpec DMA-gather path.
        raise NotImplementedError("dense one-hot path requires vocab < 65536")

    chunk = 128 if "v5" in _device_kind() else 256      # MXU-width vocab chunks
    vpad = _round_up(max(V, chunk), chunk)
    mp = _round_up(E + 2, 16)

    # Packed LHS: rows [0,E)=emb.T, row E = per-row sum of squares, row E+1=lin.
    wt = jnp.zeros((mp, vpad), jnp.float32)
    wt = wt.at[0:E, 0:V].set(emb.T)
    wt = wt.at[E, 0:V].set(jnp.sum(emb * emb, axis=1))
    wt = wt.at[E + 1, 0:V].set(lin[:, 0])
    w_hi = wt.astype(jnp.bfloat16)
    w_lo = (wt - w_hi.astype(jnp.float32)).astype(jnp.bfloat16)
    w_packed = jnp.concatenate([w_hi, w_lo], axis=0)     # (2*MP, VPAD), one input

    # Owner-field one-hot selector (disjoint offsets => exactly one 1 per row).
    offsets_np = np.asarray(params["offsets"])
    sel = np.zeros((vpad, F), np.float32)
    for f in range(F):
        start = int(offsets_np[f])
        sel[start:start + int(field_dims[f]), f] = 1.0
    sel = jnp.asarray(sel, jnp.bfloat16)

    return dict(w_packed=w_packed, sel=sel,
                bias=params["lin_bias"].reshape((1,)).astype(jnp.float32),
                offsets=params["offsets"].astype(jnp.int32),
                embed_dim=E, vocab=V, num_fields=F, mp=mp, vpad=vpad,
                chunk=chunk, num_chunks=vpad // chunk,
                two_byte=bool(V > 256))


def fm_forward(x, packed, block_b=512):
    """x: (B, F) int32 per-field indices. Returns (B,) f32 probabilities."""
    B, F = x.shape
    assert F == packed["num_fields"]
    idx = x.astype(jnp.int32) + packed["offsets"][None, :]       # (B, F) global

    # Batch on the lane axis; keep >=2 grid steps whenever B allows so the
    # ("parallel",) grid can be sharded across both v7x TensorCores.
    tb = min(block_b, max(128, _round_up(-(-B // 2), 128)))
    b_pad = _round_up(B, tb)
    idx_t = jnp.zeros((F, b_pad), jnp.int32).at[:, :B].set(idx.T)

    mp, vpad = packed["mp"], packed["vpad"]
    kernel = functools.partial(
        _fm_kernel, embed_dim=packed["embed_dim"], mp=mp,
        chunk=packed["chunk"], num_chunks=packed["num_chunks"],
        two_byte=packed["two_byte"])

    out = pl.pallas_call(
        kernel,
        out_shape=jax.ShapeDtypeStruct((1, b_pad), jnp.float32),
        grid=(b_pad // tb,),
        in_specs=[
            pl.BlockSpec((F, tb), lambda i: (0, i)),               # streamed indices
            pl.BlockSpec((2 * mp, vpad), lambda i: (0, 0)),        # resident packed table
            pl.BlockSpec((vpad, F), lambda i: (0, 0)),             # resident field selector
            pl.BlockSpec(memory_space=pltpu.MemorySpace.SMEM),     # scalar bias
        ],
        out_specs=pl.BlockSpec((1, tb), lambda i: (0, i)),         # lane-dense output
        compiler_params=pltpu.CompilerParams(
            dimension_semantics=("parallel",),
            vmem_limit_bytes=32 * 1024 * 1024,
        ),
    )(idx_t, packed["w_packed"], packed["sel"], packed["bias"])
    return out[0, :B]


def fm_reference(x, params):
    """Pure-JAX reference matching the PyTorch model (gather-based, exact f32)."""
    idx = x.astype(jnp.int32) + params["offsets"][None, :]
    emb = jnp.take(params["emb_table"], idx, axis=0)                      # (B,F,E)
    lin = jnp.sum(jnp.take(params["lin_table"], idx, axis=0)[..., 0], axis=1) \
        + params["lin_bias"][0]
    ssum = jnp.sum(emb, axis=1)
    fm = 0.5 * jnp.sum(ssum * ssum - jnp.sum(emb * emb, axis=1), axis=1)
    return jax.nn.sigmoid(lin + fm)


if __name__ == "__main__":
    field_dims = [10, 20, 30, 40]
    embed_dim = 16
    batch = 8

    key = jax.random.PRNGKey(0)
    pkey, xkey = jax.random.split(key)
    params = init_params(pkey, field_dims, embed_dim)
    packed = pack_params(params)          # one-time weight packing (hoisted)

    # per-field indices in [0, field_dims[f])
    cols = []
    xkeys = jax.random.split(xkey, len(field_dims))
    for f, fd in enumerate(field_dims):
        cols.append(jax.random.randint(xkeys[f], (batch,), 0, fd, dtype=jnp.int32))
    x = jnp.stack(cols, axis=1)           # (B, F) int32

    out = jax.block_until_ready(fm_forward(x, packed))
    ref = jax.block_until_ready(fm_reference(x, params))
    np.testing.assert_allclose(np.asarray(out), np.asarray(ref),
                               rtol=2e-4, atol=2e-5)

    print("KERNEL_OK")
</pallas_src>

<mosaic_0001>
module attributes {stable_mosaic.version = 11 : i64} {
  func.func @_fm_kernel(%arg0: i32, %arg1: memref<4x128xi32, #tpu.memory_space<vmem>>, %arg2: memref<64x256xbf16, #tpu.memory_space<vmem>>, %arg3: memref<256x4xbf16, #tpu.memory_space<vmem>>, %arg4: memref<1xf32, #tpu.memory_space<smem>>, %arg5: memref<1x128xf32, #tpu.memory_space<vmem>>) attributes {dimension_semantics = [#tpu.dimension_semantics<parallel>], iteration_bounds = array<i64: 1>, scalar_prefetch = 0 : i64, scratch_operands = 0 : i64, tpu.core_type = #tpu.core_type<tc>, window_params = [{transform_indices = @transform_0, window_bounds = array<i64: 4, 128>}, {pipeline_mode = #tpu.pipeline_mode<synchronous>, transform_indices = @transform_1, window_bounds = array<i64: 64, 256>}, {pipeline_mode = #tpu.pipeline_mode<synchronous>, transform_indices = @transform_2, window_bounds = array<i64: 256, 4>}, {transform_indices = @transform_3, window_bounds = array<i64: 1>}, {transform_indices = @transform_4, window_bounds = array<i64: 1, 128>}]} {
    %c0 = arith.constant 0 : index
    %c0_0 = arith.constant 0 : index
    %0 = vector.load %arg1[%c0, %c0_0] : memref<4x128xi32, #tpu.memory_space<vmem>>, vector<4x128xi32>
    %c255_i32 = arith.constant 255 : i32
    %1 = vector.broadcast %c255_i32 : i32 to vector<4x128xi32>
    %2 = arith.andi %0, %1 : vector<4x128xi32>
    %3 = arith.sitofp %2 : vector<4x128xi32> to vector<4x128xbf16>
    %cst = arith.constant 0.000000e+00 : f32
    %4 = vector.broadcast %cst : f32 to vector<32x128xf32>
    %c0_1 = arith.constant 0 : index
    %c0_2 = arith.constant 0 : index
    %5 = vector.load %arg3[%c0_1, %c0_2] : memref<256x4xbf16, #tpu.memory_space<vmem>>, vector<256x4xbf16>
    %cst_3 = arith.constant dense<0.000000e+00> : vector<256x128xf32>
    %6 = tpu.matmul %5, %3, %cst_3 {dimension_numbers = #tpu.dot_dimension_numbers<[1], [0], [0], [1], [0, 0, 1, 1], [], []>} : vector<256x4xbf16>, vector<4x128xbf16>, vector<256x128xf32> -> vector<256x128xf32>
    %7 = tpu.iota {dimensions = array<i32: 0>} : vector<256x128xi32>
    %c0_i32 = arith.constant 0 : i32
    %8 = vector.broadcast %c0_i32 : i32 to vector<256x128xi32>
    %9 = arith.addi %7, %8 : vector<256x128xi32>
    %10 = arith.sitofp %9 : vector<256x128xi32> to vector<256x128xf32>
    %11 = arith.cmpf oeq, %10, %6 : vector<256x128xf32>
    %12 = arith.extui %11 : vector<256x128xi1> to vector<256x128xi32>
    %13 = arith.sitofp %12 : vector<256x128xi32> to vector<256x128xf32>
    %14 = arith.truncf %13 : vector<256x128xf32> to vector<256x128xbf16>
    %c0_4 = arith.constant 0 : index
    %c0_5 = arith.constant 0 : index
    %15 = vector.load %arg2[%c0_4, %c0_5] : memref<64x256xbf16, #tpu.memory_space<vmem>>, vector<64x256xbf16>
    %cst_6 = arith.constant dense<0.000000e+00> : vector<64x128xf32>
    %16 = tpu.matmul %15, %14, %cst_6 {dimension_numbers = #tpu.dot_dimension_numbers<[1], [0], [0], [1], [0, 0, 1, 1], [], []>} : vector<64x256xbf16>, vector<256x128xbf16>, vector<64x128xf32> -> vector<64x128xf32>
    %17 = vector.extract_strided_slice %16 {offsets = [0, 0], sizes = [32, 128], strides = [1, 1]} : vector<64x128xf32> to vector<32x128xf32>
    %18 = arith.addf %4, %17 : vector<32x128xf32>
    %19 = vector.extract_strided_slice %16 {offsets = [32, 0], sizes = [32, 128], strides = [1, 1]} : vector<64x128xf32> to vector<32x128xf32>
    %20 = arith.addf %18, %19 : vector<32x128xf32>
    %21 = vector.extract_strided_slice %20 {offsets = [0, 0], sizes = [16, 128], strides = [1, 1]} : vector<32x128xf32> to vector<16x128xf32>
    %22 = vector.extract_strided_slice %20 {offsets = [16, 0], sizes = [1, 128], strides = [1, 1]} : vector<32x128xf32> to vector<1x128xf32>
    %23 = vector.extract_strided_slice %20 {offsets = [17, 0], sizes = [1, 128], strides = [1, 1]} : vector<32x128xf32> to vector<1x128xf32>
    %24 = arith.mulf %21, %21 : vector<16x128xf32>
    %cst_7 = arith.constant dense<0.000000e+00> : vector<128xf32>
    %25 = vector.multi_reduction <add>, %24, %cst_7 [0] : vector<16x128xf32> to vector<128xf32>
    %26 = vector.shape_cast %25 : vector<128xf32> to vector<1x128xf32>
    %27 = arith.subf %26, %22 : vector<1x128xf32>
    %cst_8 = arith.constant 5.000000e-01 : f32
    %28 = vector.broadcast %cst_8 : f32 to vector<1x128xf32>
    %29 = arith.mulf %28, %27 : vector<1x128xf32>
    %30 = arith.addf %29, %23 : vector<1x128xf32>
    %c0_9 = arith.constant 0 : index
    %31 = memref.load %arg4[%c0_9] : memref<1xf32, #tpu.memory_space<smem>>
    %32 = vector.broadcast %31 : f32 to vector<1x128xf32>
    %33 = arith.addf %30, %32 : vector<1x128xf32>
    %34 = arith.negf %33 : vector<1x128xf32>
    %35 = math.exp %34 : vector<1x128xf32>
    %cst_10 = arith.constant 1.000000e+00 : f32
    %36 = vector.broadcast %cst_10 : f32 to vector<1x128xf32>
    %37 = arith.addf %36, %35 : vector<1x128xf32>
    %38 = arith.divf %36, %37 : vector<1x128xf32>
    %c0_11 = arith.constant 0 : index
    %c0_12 = arith.constant 0 : index
    %39 = vector.load %arg5[%c0_11, %c0_12] : memref<1x128xf32, #tpu.memory_space<vmem>>, vector<1x128xf32>
    tpu.vector_store %arg5[%c0_11, %c0_12], %38 {strides = array<i32>} : memref<1x128xf32, #tpu.memory_space<vmem>>, vector<1x128xf32>,
    return
  }
  func.func @transform_0(%arg0: i32) -> (i32, i32) {
    %c0_i32 = arith.constant 0 : i32
    %c0_i32_0 = arith.constant 0 : i32
    return %c0_i32, %arg0 : i32, i32
  }
  func.func @transform_1(%arg0: i32) -> (i32, i32) {
    %c0_i32 = arith.constant 0 : i32
    %c0_i32_0 = arith.constant 0 : i32
    %c0_i32_1 = arith.constant 0 : i32
    return %c0_i32, %c0_i32_0 : i32, i32
  }
  func.func @transform_2(%arg0: i32) -> (i32, i32) {
    %c0_i32 = arith.constant 0 : i32
    %c0_i32_0 = arith.constant 0 : i32
    %c0_i32_1 = arith.constant 0 : i32
    return %c0_i32, %c0_i32_0 : i32, i32
  }
  func.func @transform_3(%arg0: i32) -> i32 {
    %c0_i32 = arith.constant 0 : i32
    %c0_i32_0 = arith.constant 0 : i32
    return %c0_i32 : i32
  }
  func.func @transform_4(%arg0: i32) -> (i32, i32) {
    %c0_i32 = arith.constant 0 : i32
    %c0_i32_0 = arith.constant 0 : i32
    return %c0_i32, %arg0 : i32, i32
  }
}

</mosaic_0001>

<bundles_post_ra>
// kernel: tpu_custom_call.1
= control target key start
LH: loop header
LB: loop body
LE: loop exit
PB: predicated region body
PF: predicated region fallthrough
CT: control target
= control target key end

     0   :  { %vm136_vm0 = vcmask 31744   ;;  %vm185_vm1 = vcmask 1041408   ;;  %s1293_s0 = inlined_call_operand.vmem [shape: s32[4,128], index: 0, kind: input, shape index: {}]   ;;  %s1294_s1 = inlined_call_operand.vmem [shape: bf16[64,256], index: 1, kind: input, shape index: {}]   ;;  %s1295_s2 = inlined_call_operand.vmem [shape: bf16[256,4], index: 2, kind: input, shape index: {}]   ;;  %s1296_s3 = inlined_call_operand.<no memory space> [shape: f32[1], index: 3, kind: input, shape index: {}]   ;;  %s1297_s4 = inlined_call_operand.hbm [shape: f32[1,128], index: 4, kind: output, shape index: {}]  }
   0x1   :  { %v20_v0 = vld [vmem:[%s1293_s0] sm:$0xf]  ;;  %v883_v6 = vld [vmem:[%s1295_s2 + $0x8] sm:$0xff]   ;;  %v884_v7 = vld [vmem:[%s1295_s2 + $0x10] sm:$0xff]  }
   0x2   :  { %v882_v1 = vld [vmem:[%s1295_s2] sm:$0xff]   ;;  %v21_v2 = vand.u32 255, %v20_v0  ;;  %v885_v8 = vld [vmem:[%s1295_s2 + $0x18] sm:$0xff]  }
   0x3   :  { %847 = vmatprep.mubr.msk.bf16.mxu0 %vm136_vm0, %v882_v1  ;;  %v886_v9 = vld [vmem:[%s1295_s2 + $0x20] sm:$0xff]  }
   0x4   :  { %v22_v3 = vcvt.s32.f32 %v21_v2 }
   0x6   :  { %v23_v4 = vpack.c.bf16 %v22_v3, %v22_v3 }
   0x8   :  { %879 = vmatprep.subr.msk.bf16.mxu0 %vm185_vm1, %v23_v4  ;;  %v187_v5 = vsel %vm185_vm1, %v23_v4, 0 }
   0x9   :  { %846 = vmatpush3.bf16.msra.mxu0 %v187_v5 }
   0xc   :  { %848 = vmatmul.mubr.msk.bf16.vlgmr.msra.gmra.mrb[0].mxu0 %vm136_vm0, %v883_v6 }
   0xd   :  { %851 = vmatprep.mubr.msk.bf16.mxu0 %vm136_vm0, %v884_v7 }
  0x14   :  { %852 = vmatmul.mubr.msk.bf16.gmra.mrb[4].mxu0 %vm136_vm0, %v885_v8 }
  0x15   :  { %10 = vsyncpa [#allocation4], 0  ;;  %855 = vmatprep.mubr.msk.bf16.mxu0 %vm136_vm0, %v886_v9  ;;  %v887_v10 = vld [vmem:[%s1295_s2 + $0x28] sm:$0xff]   ;;  %v888_v11 = vld [vmem:[%s1295_s2 + $0x30] sm:$0xff]   ;;  %v350_v22 = vlaneseq  ;;  %v1321_v2 = vmov 0  ;;  %v1323_v3 = vmov 0 }
  0x16   :  { %v889_v12 = vld [vmem:[%s1295_s2 + $0x38] sm:$0xff]   ;;  %v890_v13 = vld [vmem:[%s1295_s2 + $0x40] sm:$0xff]   ;;  %v891_v14 = vld [vmem:[%s1295_s2 + $0x48] sm:$0xff]   ;;  %v1325_v7 = vmov 0  ;;  %s939_s11 = smov [#allocation3]  }
  0x17   :  { %v892_v15 = vld [vmem:[%s1295_s2 + $0x50] sm:$0xff]   ;;  %v893_v16 = vld [vmem:[%s1295_s2 + $0x58] sm:$0xff]   ;;  %v894_v17 = vld [vmem:[%s1295_s2 + $0x60] sm:$0xff]   ;;  %v1035_v23 = vshrl.u32 %v350_v22, 7  ;;  %s675_s12 = sshll.u32 %s939_s11, 4  ;;  %s676_s12 = int_to_ptr.vmem [resolvable:$true] %s675_s12 }
  0x18   :  { %v895_v18 = vld [vmem:[%s1295_s2 + $0x68] sm:$0xff]   ;;  %v896_v19 = vld [vmem:[%s1295_s2 + $0x70] sm:$0xff]   ;;  %v897_v20 = vld [vmem:[%s1295_s2 + $0x78] sm:$0xff]   ;;  %s914_s13 = scalar_lea.vmem %s676_s12, 16  ;;  %s918_s14 = scalar_lea.vmem %s676_s12, 32 }
  0x19   :  { %v900_v21 = vld [vmem:[%s1294_s1 + $0x4] ss:$8 sps:$4 sm:$0xff]   ;;  %v353_v24 = vadd.s32 16, %v1035_v23  ;;  %v354_v25 = vadd.s32 24, %v1035_v23  ;;  %v352_v26 = vadd.s32 8, %v1035_v23  ;;  %v383_v30 = vcvt.s32.f32 %v1035_v23  ;;  %p915_p0 = scmp.ne.s32.totalorder %s676_s12, %s914_s13  ;;  %p919_p1 = scmp.lt.s32.totalorder %s676_s12, %s676_s12 }
  0x1a   :  { %607 = vmatprep.mubr.bf16.mxu1 %v900_v21  ;;  %v357_v37 = vadd.s32 48, %v1035_v23  ;;  %v358_v38 = vadd.s32 56, %v1035_v23  ;;  %v355_v41 = vadd.s32 32, %v1035_v23  ;;  %v356_v42 = vadd.s32 40, %v1035_v23  ;;  %v904_v8 = vld [vmem:[%s1294_s1 + $0x24] ss:$8 sps:$4 sm:$0xff]   ;;  %p920_p2 = scmp.lt.s32.totalorder %s918_s14, %s914_s13 }
  0x1b   :  { %v385_v27 = vcvt.s32.f32 %v353_v24  ;;  %v386_v28 = vcvt.s32.f32 %v354_v25  ;;  %v384_v31 = vcvt.s32.f32 %v352_v26  ;;  %v361_v53 = vadd.s32 80, %v1035_v23 }
  0x1c   :  { %856 = vmatmul.mubr.msk.bf16.gmra.mrb[8].mxu0 %vm136_vm0, %v887_v10  ;;  %v389_v43 = vcvt.s32.f32 %v357_v37  ;;  %v390_v44 = vcvt.s32.f32 %v358_v38  ;;  %v387_v46 = vcvt.s32.f32 %v355_v41  ;;  %v388_v47 = vcvt.s32.f32 %v356_v42  ;;  %p921_p3 = por %p920_p2, %p919_p1 }
  0x1d   :  { %859 = vmatprep.mubr.msk.bf16.mxu0 %vm136_vm0, %v888_v11  ;;  %v362_v54 = vadd.s32 88, %v1035_v23  ;;  %v359_v57 = vadd.s32 64, %v1035_v23  ;;  %v360_v58 = vadd.s32 72, %v1035_v23  ;;  %v393_v59 = vcvt.s32.f32 %v361_v53 }
  0x1e   :  { %v365_v5 = vadd.s32 112, %v1035_v23  ;;  %v366_v6 = vadd.s32 120, %v1035_v23  ;;  %v363_v9 = vadd.s32 96, %v1035_v23  ;;  %v364_v10 = vadd.s32 104, %v1035_v23  ;;  %p922_p4 = pnand %p921_p3, %p915_p0 }
  0x1f   :  { %v394_v60 = vcvt.s32.f32 %v362_v54  ;;  %v391_v62 = vcvt.s32.f32 %v359_v57  ;;  %v392_v63 = vcvt.s32.f32 %v360_v58  ;;  %v369_v21 = vadd.s32 144, %v1035_v23 }
  0x20   :  { %v397_v11 = vcvt.s32.f32 %v365_v5  ;;  %v370_v22 = vadd.s32 152, %v1035_v23  ;;  %v1333_v24 = vmov 0  ;;  %v1335_v25 = vmov 0 }
  0x21   :  { %v367_v26 = vadd.s32 128, %v1035_v23  ;;  %v373_v42 = vadd.s32 176, %v1035_v23  ;;  %v377_v40 = vadd.s32 208, %v1035_v23  ;;  %v381_v56 = vadd.s32 240, %v1035_v23 }
  0x23   :  { %v409_v34 = vcvt.s32.f32 %v377_v40  ;;  %v413_v50 = vcvt.s32.f32 %v381_v56 }
  0x24   :  { %860 = vmatmul.mubr.msk.bf16.gmra.mrb[12].mxu0 %vm136_vm0, %v889_v12  ;;  %v398_v12 = vcvt.s32.f32 %v366_v6 }
  0x25   :  { %863 = vmatprep.mubr.msk.bf16.mxu0 %vm136_vm0, %v890_v13 }
  0x2c   :  { %864 = vmatmul.mubr.msk.bf16.gmra.mrb[16].mxu0 %vm136_vm0, %v891_v14  ;;  %v395_v14 = vcvt.s32.f32 %v363_v9 }
  0x2d   :  { %867 = vmatprep.mubr.msk.bf16.mxu0 %vm136_vm0, %v892_v15  ;;  %v396_v15 = vcvt.s32.f32 %v364_v10  ;;  %v382_v10 = vadd.s32 248, %v1035_v23 }
  0x2f   :  { %v414_v51 = vcvt.s32.f32 %v382_v10 }
  0x34   :  { %868 = vmatmul.mubr.msk.bf16.gmra.mrb[20].mxu0 %vm136_vm0, %v893_v16 }
  0x35   :  { %871 = vmatprep.mubr.msk.bf16.mxu0 %vm136_vm0, %v894_v17 }
  0x3c   :  { %872 = vmatmul.mubr.msk.bf16.gmra.mrb[24].mxu0 %vm136_vm0, %v895_v18  ;;  %v1329_v18 = vmov 0 }
  0x3d   :  { %875 = vmatprep.mubr.msk.bf16.mxu0 %vm136_vm0, %v896_v19  ;;  %v1331_v19 = vmov 0 }
  0x44   :  { %876 = vmatmul.mubr.msk.bf16.gmra.mrb[28].mxu0 %vm136_vm0, %v897_v20 }
  0xdf   :  { %v849_v29 = vpop.f32.mrb[0].mxu0 }
  0xe0   :  { %v223_v32 = vpop.f32.mrb[1].mxu0  ;;  %vm1041_vm2 = vcmp.eq.f32.partialorder %v385_v27, %v849_v29  ;;  %v368_v27 = vadd.s32 136, %v1035_v23  ;;  %v402_v29 = vcvt.s32.f32 %v370_v22 }
  0xe1   :  { %v850_v33 = vpop.f32.mrb[2].mxu0  ;;  %vm1051_vm4 = vcmp.eq.f32.partialorder %v383_v30, %v223_v32 }
  0xe2   :  { %vm1045_vm3 = vcmp.eq.f32.partialorder %v386_v28, %v850_v33  ;;  %v226_v36 = vpop.f32.mrb[3].mxu0  ;;  %v401_v28 = vcvt.s32.f32 %v369_v21  ;;  %v400_v32 = vcvt.s32.f32 %v368_v27 }
  0xe3   :  { %vm1059_vm6 = vcmp.eq.f32.partialorder %v384_v31, %v226_v36  ;;  %v399_v31 = vcvt.s32.f32 %v367_v26 }
  0xe7   :  { %v853_v45 = vpop.f32.mrb[4].mxu0 }
  0xe8   :  { %v239_v48 = vpop.f32.mrb[5].mxu0  ;;  %vm1069_vm8 = vcmp.eq.f32.partialorder %v389_v43, %v853_v45  ;;  %v374_v43 = vadd.s32 184, %v1035_v23  ;;  %v372_v45 = vadd.s32 168, %v1035_v23 }
  0xe9   :  { %v854_v49 = vpop.f32.mrb[6].mxu0  ;;  %vm1079_vm10 = vcmp.eq.f32.partialorder %v387_v46, %v239_v48  ;;  %v938_v46 = vmov 1.0|1.0  }
  0xea   :  { %vm1073_vm9 = vcmp.eq.f32.partialorder %v390_v44, %v854_v49  ;;  %v242_v52 = vpop.f32.mrb[7].mxu0  ;;  %v371_v44 = vadd.s32 160, %v1035_v23  ;;  %v406_v48 = vcvt.s32.f32 %v374_v43  ;;  %v404_v53 = vcvt.s32.f32 %v372_v45 }
  0xeb   :  { %vm1087_vm12 = vcmp.eq.f32.partialorder %v388_v47, %v242_v52  ;;  %v405_v47 = vcvt.s32.f32 %v373_v42 }
  0xec   :  { %v403_v52 = vcvt.s32.f32 %v371_v44 }
  0xef   :  { %v857_v61 = vpop.f32.mrb[8].mxu0 }
  0xf0   :  { %v255_v0 = vpop.f32.mrb[9].mxu0  ;;  %vm1097_vm14 = vcmp.eq.f32.partialorder %v393_v59, %v857_v61  ;;  %v375_v61 = vadd.s32 192, %v1035_v23 }
  0xf1   :  { %v858_v1 = vpop.f32.mrb[10].mxu0  ;;  %v1322_v2 = vsel %vm1097_vm14, 4294967295, %v1321_v2  ;;  %vm1107_vm0 = vcmp.eq.f32.partialorder %v391_v62, %v255_v0  ;;  %v376_v62 = vadd.s32 200, %v1035_v23 }
  0xf2   :  { %vm1101_vm15 = vcmp.eq.f32.partialorder %v394_v60, %v858_v1  ;;  %v258_v4 = vpop.f32.mrb[11].mxu0  ;;  %v1326_v7 = vsel %vm1107_vm0, 4294967295, %v1325_v7  ;;  %vm1341_vm0 = vmpackc.low %vm1059_vm6, %vm1051_vm4  ;;  %v378_v60 = vadd.s32 216, %v1035_v23  ;;  %v407_v0 = vcvt.s32.f32 %v375_v61 }
  0xf3   :  { %v1324_v3 = vsel %vm1101_vm15, 4294967295, %v1323_v3  ;;  %vm1115_vm11 = vcmp.eq.f32.partialorder %v392_v63, %v258_v4  ;;  %vm1346_vm4 = vmpackc.low %vm1045_vm3, %vm1041_vm2  ;;  %v408_v1 = vcvt.s32.f32 %v376_v62 }
  0xf4   :  { %vm1347_vm2 = vmpackc.low %vm1087_vm12, %vm1079_vm10  ;;  %v410_v35 = vcvt.s32.f32 %v378_v60 }
  0xf5   :  { %vm1352_vm10 = vmpackc.low %vm1073_vm9, %vm1069_vm8  ;;  %vm1353_vm8 = vnez %v1326_v7  ;;  %v903_v7 = vld [vmem:[%s1294_s1 + $0x10] ss:$8 sps:$4 sm:$0xff]  }
  0xf6   :  { %vm1354_vm9 = vmpackc.low %vm1115_vm11, %vm1353_vm8 }
  0xf7   :  { %v861_v13 = vpop.f32.mrb[12].mxu0 }
  0xf8   :  { %v271_v16 = vpop.f32.mrb[13].mxu0  ;;  %vm1125_vm1 = vcmp.eq.f32.partialorder %v397_v11, %v861_v13  ;;  %v379_v11 = vadd.s32 224, %v1035_v23 }
  0xf9   :  { %v862_v17 = vpop.f32.mrb[14].mxu0  ;;  %v1330_v18 = vsel %vm1125_vm1, 4294967295, %v1329_v18  ;;  %vm1135_vm13 = vcmp.eq.f32.partialorder %v395_v14, %v271_v16 }
  0xfa   :  { %vm1129_vm5 = vcmp.eq.f32.partialorder %v398_v12, %v862_v17  ;;  %v274_v20 = vpop.f32.mrb[15].mxu0  ;;  %v1334_v24 = vsel %vm1135_vm13, 4294967295, %v1333_v24  ;;  %v380_v12 = vadd.s32 232, %v1035_v23  ;;  %v411_v14 = vcvt.s32.f32 %v379_v11 }
  0xfb   :  { %v1332_v19 = vsel %vm1129_vm5, 4294967295, %v1331_v19  ;;  %vm1143_vm14 = vcmp.eq.f32.partialorder %v396_v15, %v274_v20  ;;  %v909_v20 = vld [vmem:[%s1294_s1 + $0x30] ss:$8 sps:$4 sm:$0xff]  }
  0xfc   :  { %v1336_v25 = vsel %vm1143_vm14, 4294967295, %v1335_v25  ;;  %v412_v15 = vcvt.s32.f32 %v380_v12 }
  0xff   :  { %v865_v30 = vpop.f32.mrb[16].mxu0 }
 0x100   :  { %v287_v33 = vpop.f32.mrb[17].mxu0  ;;  %vm1153_vm7 = vcmp.eq.f32.partialorder %v401_v28, %v865_v30 }
 0x101   :  { %v866_v36 = vpop.f32.mrb[18].mxu0  ;;  %vm431_vm15 = vcmp.eq.f32.partialorder %v399_v31, %v287_v33 }
 0x102   :  { %vm1157_vm1 = vcmp.eq.f32.partialorder %v402_v29, %v866_v36  ;;  %v290_v41 = vpop.f32.mrb[19].mxu0 }
 0x103   :  { %vm773_vm5 = vmpackc.low %vm1157_vm1, %vm1153_vm7  ;;  %vm432_vm13 = vcmp.eq.f32.partialorder %v400_v32, %v290_v41 }
 0x104   :  { %vm771_vm14 = vmpackc.low %vm432_vm13, %vm431_vm15 }
 0x105   :  { %805 = vmatprep.subr.msk.bf16.mxu1 %vm771_vm14, %v938_v46 }
 0x106   :  { %806 = vmatpush3.bf16.msk.msra.mxu1 %vm1341_vm0, %v938_v46 }
 0x107   :  { %v869_v49 = vpop.f32.mrb[20].mxu0  ;;  %807 = vmatprep.subr.msk.bf16.mxu1 %vm773_vm5, %v938_v46 }
 0x108   :  { %v303_v54 = vpop.f32.mrb[21].mxu0  ;;  %vm1177_vm7 = vcmp.eq.f32.partialorder %v405_v47, %v869_v49 }
 0x109   :  { %v870_v57 = vpop.f32.mrb[22].mxu0  ;;  %vm435_vm5 = vcmp.eq.f32.partialorder %v403_v52, %v303_v54 }
 0x10a   :  { %vm1181_vm13 = vcmp.eq.f32.partialorder %v406_v48, %v870_v57  ;;  %v306_v39 = vpop.f32.mrb[23].mxu0  ;;  %808 = vmatpush3.bf16.msk.msra.mxu1 %vm1346_vm4, %v938_v46 }
 0x10b   :  { %vm777_vm6 = vmpackc.low %vm1181_vm13, %vm1177_vm7  ;;  %vm436_vm14 = vcmp.eq.f32.partialorder %v404_v53, %v306_v39 }
 0x10c   :  { %vm775_vm15 = vmpackc.low %vm436_vm14, %vm435_vm5  ;;  %vm1356_vm14 = vnez %v1322_v2  ;;  %v898_v2 = vld [vmem:[%s1294_s1] ss:$8 sps:$4 sm:$0xff]  }
 0x10d   :  { %809 = vmatprep.subr.msk.bf16.mxu1 %vm775_vm15, %v938_v46 }
 0x10e   :  { %810 = vmatpush3.bf16.msk.msra.mxu1 %vm1347_vm2, %v938_v46 }
 0x10f   :  { %v873_v63 = vpop.f32.mrb[24].mxu0  ;;  %811 = vmatprep.subr.msk.bf16.mxu1 %vm777_vm6, %v938_v46  ;;  %vm1355_vm6 = vnez %v1324_v3  ;;  %v901_v3 = vld [vmem:[%s1294_s1 + $0x14] ss:$8 sps:$4 sm:$0xff]  }
 0x110   :  { %v319_v4 = vpop.f32.mrb[25].mxu0  ;;  %vm1207_vm3 = vcmp.eq.f32.partialorder %v409_v34, %v873_v63  ;;  %vm1357_vm15 = vmpackc.low %vm1355_vm6, %vm1356_vm14  ;;  %v660_v63 = vstv %s1296_s3 }
 0x111   :  { %v874_v5 = vpop.f32.mrb[26].mxu0  ;;  %vm439_vm12 = vcmp.eq.f32.partialorder %v407_v0, %v319_v4 }
 0x112   :  { %vm1211_vm0 = vcmp.eq.f32.partialorder %v410_v35, %v874_v5  ;;  %v322_v55 = vpop.f32.mrb[27].mxu0  ;;  %812 = vmatpush3.bf16.msk.msra.mxu1 %vm1352_vm10, %v938_v46  ;;  %vm1358_vm10 = vnez %v1336_v25 }
 0x113   :  { %vm781_vm1 = vmpackc.low %vm1211_vm0, %vm1207_vm3  ;;  %vm440_vm7 = vcmp.eq.f32.partialorder %v408_v1, %v322_v55 }
 0x114   :  { %vm779_vm13 = vmpackc.low %vm440_vm7, %vm439_vm12  ;;  %vm1359_vm12 = vnez %v1334_v24  ;;  %vm1361_vm7 = vnez %v1332_v19  ;;  %v907_v19 = vld [vmem:[%s1294_s1 + $0x34] ss:$8 sps:$4 sm:$0xff]  }
 0x115   :  { %813 = vmatprep.subr.msk.bf16.mxu1 %vm779_vm13, %v938_v46  ;;  %vm1362_vm13 = vnez %v1330_v18  ;;  %v906_v18 = vld [vmem:[%s1294_s1 + $0x20] ss:$8 sps:$4 sm:$0xff]  }
 0x116   :  { %814 = vmatpush3.bf16.msk.msra.mxu1 %vm1354_vm9, %v938_v46  ;;  %vm1363_vm8 = vmpackc.low %vm1361_vm7, %vm1362_vm13 }
 0x117   :  { %v877_v13 = vpop.f32.mrb[28].mxu0  ;;  %815 = vmatprep.subr.msk.bf16.mxu1 %vm781_vm1, %v938_v46  ;;  %vm1360_vm1 = vmpackc.low %vm1358_vm10, %vm1359_vm12 }
 0x118   :  { %v335_v16 = vpop.f32.mrb[29].mxu0  ;;  %vm445_vm4 = vcmp.eq.f32.partialorder %v413_v50, %v877_v13 }
 0x119   :  { %v878_v17 = vpop.f32.mrb[30].mxu0  ;;  %vm443_vm11 = vcmp.eq.f32.partialorder %v411_v14, %v335_v16 }
 0x11a   :  { %vm446_vm5 = vcmp.eq.f32.partialorder %v414_v51, %v878_v17  ;;  %v338_v23 = vpop.f32.mrb[31].mxu0  ;;  %816 = vmatpush3.bf16.msk.msra.mxu1 %vm1357_vm15, %v938_v46 }
 0x11b   :  { %vm785_vm2 = vmpackc.low %vm446_vm5, %vm445_vm4  ;;  %vm444_vm3 = vcmp.eq.f32.partialorder %v412_v15, %v338_v23 }
 0x11c   :  { %vm783_vm0 = vmpackc.low %vm444_vm3, %vm443_vm11 }
 0x11d   :  { %817 = vmatprep.subr.msk.bf16.mxu1 %vm783_vm0, %v938_v46 }
 0x11e   :  { %818 = vmatpush3.bf16.msk.msra.mxu1 %vm1360_vm1, %v938_v46 }
 0x11f   :  { %819 = vmatprep.subr.msk.bf16.mxu1 %vm785_vm2, %v938_v46 }
 0x122   :  { %820 = vmatpush3.bf16.msk.msra.mxu1 %vm1363_vm8, %v938_v46 }
 0x125   :  { %608 = vmatmul.mubr.bf16.vlgmr.msra.gmra.mrb[0].mxu1 %v898_v2 }
 0x126   :  { %615 = vmatprep.mubr.bf16.mxu1 %v901_v3 }
 0x12d   :  { %616 = vmatmul.mubr.bf16.gmra.mrb[4].mxu1 %v903_v7 }
 0x12e   :  { %622 = vmatprep.mubr.bf16.mxu1 %v904_v8 }
 0x135   :  { %623 = vmatmul.mubr.bf16.gmra.mrb[8].mxu1 %v906_v18 }
 0x136   :  { %630 = vmatprep.mubr.bf16.mxu1 %v907_v19 }
 0x13d   :  { %631 = vmatmul.mubr.bf16.gmra.mrb[12].mxu1 %v909_v20 }
 0x1f8   :  { %v821_v21 = vpop.f32.mrb[0].mxu1 }
 0x1f9   :  { %v822_v22 = vpop.f32.mrb[1].mxu1 }
 0x1fa   :  { %v823_v24 = vadd.f32 %v822_v22, %v821_v21  ;;  %v824_v25 = vpop.f32.mrb[2].mxu1 }
 0x1fb   :  { %v825_v26 = vpop.f32.mrb[3].mxu1 }
 0x1fc   :  { %v826_v27 = vadd.f32 %v825_v26, %v824_v25 }
 0x200   :  { %v827_v28 = vpop.f32.mrb[4].mxu1 }
 0x201   :  { %v828_v29 = vpop.f32.mrb[5].mxu1 }
 0x202   :  { %v829_v30 = vadd.f32 %v828_v29, %v827_v28  ;;  %v830_v31 = vpop.f32.mrb[6].mxu1 }
 0x203   :  { %v831_v32 = vpop.f32.mrb[7].mxu1 }
 0x208   :  { %v833_v33 = vpop.f32.mrb[8].mxu1 }
 0x209   :  { %v834_v36 = vpop.f32.mrb[9].mxu1 }
 0x20a   :  { %v835_v37 = vadd.f32 %v834_v36, %v833_v33  ;;  %v836_v38 = vpop.f32.mrb[10].mxu1 }
 0x20b   :  { %v837_v41 = vpop.f32.mrb[11].mxu1 }
 0x20c   :  { %v641_v42 = vadd.f32 %v835_v37, %v823_v24  ;;  %v838_v43 = vadd.f32 %v837_v41, %v836_v38 }
 0x20e   :  { %v642_v44 = vadd.f32 %v838_v43, %v826_v27  ;;  %v644_v45 = vmul.f32 %v641_v42, %v641_v42 }
 0x210   :  { %v645_v46 = vmul.f32 %v642_v44, %v642_v44  ;;  %v839_v47 = vpop.f32.mrb[12].mxu1 }
 0x211   :  { %v840_v48 = vpop.f32.mrb[13].mxu1 }
 0x212   :  { %v646_v49 = vadd.f32 %v645_v46, %v644_v45  ;;  %v841_v52 = vadd.f32 %v840_v48, %v839_v47  ;;  %v842_v53 = vpop.f32.mrb[14].mxu1 }
 0x213   :  { %v843_v54 = vpop.f32.mrb[15].mxu1 }
 0x214   :  { %v647_v57 = vrot.slane %v646_v49, 4  ;;  %v643_v58 = vadd.f32 %v841_v52, %v829_v30 }
 0x216   :  { %v648_v59 = vadd.f32 %v647_v57, %v646_v49  ;;  %v656_v35 = vrot.slane %v643_v58, 1 }
 0x218   :  { %v649_v39 = vrot.slane %v648_v59, 2 }
 0x21a   :  { %v650_v40 = vadd.f32 %v649_v39, %v648_v59 }
 0x21c   :  { %v651_v60 = vrot.slane %v650_v40, 1 }
 0x21e   :  { %v652_v61 = vadd.f32 %v651_v60, %v650_v40 }
 0x220   :  { %v653_v62 = vsub.f32 %v652_v61, %v643_v58 }
 0x222   :  { %v654_v34 = vmul.f32 0.5, %v653_v62 }
 0x224   :  { %v658_v0 = vadd.f32 %v656_v35, %v654_v34 }
 0x226   :  { %v661_v1 = vadd.f32 %v660_v63, %v658_v0 }
 0x228   :  { %v787_v4 = vmul.f32 -1.442695, %v661_v1 }
 0x22a   :  { %910 = vpow2.f32 %v787_v4 }
 0x234   :  { %v911_v5 = vpop.eup %910 }
 0x235   :  { %v665_v6 = vadd.f32 1.0, %v911_v5 }
 0x237   :  { %912 = vrcp.f32 %v665_v6 }
 0x241   :  { %v913_v9 = vpop.eup %912 }
 0x242   :  { %668 = vst [vmem:[#allocation3] sm:$0x1] %v913_v9 }
 0x243   :  { %925 = shalt.err (!%p922_p4)
}
 0x244   :  { %s926_s16 = scalar_lea.hbm %s1297_s4, 16 }
 0x245   :  { %p927_p5 = scmp.ne.s32.totalorder %s1297_s4, %s926_s16  ;;  %p930_p6 = scmp.lt.u32.totalorder %s926_s16, %s1297_s4 }
 0x247   :  { %p932_p7 = pnand %p930_p6, %p927_p5 }
 0x249   :  { %935 = shalt.err (!%p932_p7)
}
 0x24a   :  { %678 = dma.vmem_to_hbm [thread:$0]  %s676_s12, 16, %s1297_s4, [#allocation4]  }
 0x24b   :  { %936 = dma.done.wait [#allocation4], 16  }
 0x24c   :  { %937 = vsyncadd [#allocation4], 4294967280 }
 0x24d   :  { %682 = vsyncpa [#allocation4], 1 }

</bundles_post_ra>
